<compile_context>
chip_gen: v7x
topology: tpu7x:2x2x1
jax: 0.10.0
libtpu: 0.0.40
codegen_flags: <defaults>
</compile_context>

<pallas_src>
import jax
import jax.numpy as jnp
from jax.experimental import pallas as pl
from jax.experimental.pallas import tpu as pltpu

K = 5            # conv kernel size
PAD = 2          # padding=2 -> "same" conv at stride 1
HALO = 8         # per-block halo rows (keeps residual/core reads sublane aligned)
EPS = 1e-5


def basic_block2_kernel(x_ref, m_ref, w1_ref, w2_ref, s1_ref, b1_ref,
                        s2_ref, b2_ref, out_ref):
    """One tile of BT samples per grid step, flattened to a 2-D row slab.

    x_ref   : (1, RB, CP) f32   RB = HALO + BT*LP + HALO rows; each sample occupies
                                LP = L + 2*PAD rows ([PAD zeros][L data][PAD zeros])
    m_ref   : (RH, 1)     f32   1.0 on real-data rows, 0.0 on pad rows
                                (RH = BT*LP + 2*PAD = conv1 output rows)
    w1_ref  : (K*CP, CP)  bf16  conv1 weights, taps stacked on the contraction dim
    w2_ref  : (K*CP, CP)  bf16  conv2 weights
    s*_ref  : (1, CP)     f32   folded BN scale  gamma / sqrt(var + eps)
    b*_ref  : (1, CP)     f32   folded BN bias   beta - mean * scale
    out_ref : (1, R, CP)  f32   R = BT*LP core rows (pad rows dropped on host)
    """
    R = out_ref.shape[1]
    RH = R + 2 * PAD                      # conv1 is evaluated on core rows +/- PAD

    x_f32 = x_ref[0]                      # (RB, CP); residual stays exact f32
    x_bf = x_f32.astype(jnp.bfloat16)     # matmul operand only

    # ---- conv1: fuse the K shifted taps into ONE MXU matmul ----
    # conv1 output (local row t) = abs row t + HALO - PAD; tap k reads abs row
    # t + HALO - 2*PAD + k, hence slice start HALO - 2*PAD + k.
    a1 = jnp.concatenate(
        [x_bf[HALO - 2 * PAD + k: HALO - 2 * PAD + k + RH, :] for k in range(K)],
        axis=-1)                                             # (RH, K*CP) bf16
    h = jnp.dot(a1, w1_ref[...], preferred_element_type=jnp.float32)

    # ---- bn1 + relu (f32 VPU), then zero the pad rows so conv2 sees the same
    # zero padding a standalone conv would.  Replaces the old VMEM scratch
    # round-trip: the padded intermediate never leaves vregs. ----
    h = jnp.maximum(h * s1_ref[0] + b1_ref[0], 0.0)
    h = h * m_ref[...]                                       # (RH, CP)
    h_bf = h.astype(jnp.bfloat16)

    # ---- conv2: same fused-tap matmul, output only on the R core rows ----
    a2 = jnp.concatenate(
        [h_bf[k:k + R, :] for k in range(K)], axis=-1)       # (R, K*CP) bf16
    o = jnp.dot(a2, w2_ref[...], preferred_element_type=jnp.float32)

    # ---- bn2 + residual (exact f32 x) + relu; lane-dense unmasked store ----
    res = x_f32[HALO:HALO + R, :]
    o = jnp.maximum(o * s2_ref[0] + b2_ref[0] + res, 0.0)
    out_ref[0] = o.astype(out_ref.dtype)


def basic_block2(x_ncl, w1, w2, bn1, bn2, eps=EPS, b_tile=8):
    """x_ncl : (N, C, L) f32 (PyTorch NCL layout)
    w1, w2  : (C, C, K) PyTorch Conv1d weights (out, in, k)
    bn1/bn2 : dicts with 'gamma', 'beta', 'mean', 'var', each (C,)
    Returns (N, C, L) f32."""
    N, C, L = x_ncl.shape

    CP = ((C + 127) // 128) * 128          # lane-dense channel pad (>= 128)
    LP = L + 2 * PAD                       # rows per sample (zero pad both ends)
    BT = max(1, min(b_tile, N))            # samples per grid step
    NP = ((N + BT - 1) // BT) * BT         # batch padded to a tile multiple
    NB = NP // BT                          # grid size
    R = BT * LP                            # core rows per block
    RB = R + 2 * HALO                      # block rows incl. zero halo
    RH = R + 2 * PAD                       # conv1 output rows

    # ---- glue: layout conversion + parameter folding (plain JAX) ----
    x_nlc = jnp.transpose(x_ncl, (0, 2, 1)).astype(jnp.float32)       # (N, L, C)
    xp = jnp.pad(x_nlc, ((0, NP - N), (PAD, PAD), (0, CP - C)))       # (NP, LP, CP)
    xp = xp.reshape(NB, R, CP)
    xp = jnp.pad(xp, ((0, 0), (HALO, HALO), (0, 0)))                  # (NB, RB, CP)

    # Row mask over conv1 output rows: 1.0 exactly on rows holding real data.
    row_valid = jnp.pad(jnp.ones((L,), jnp.float32), (PAD, PAD))      # (LP,)
    mask = jnp.pad(jnp.tile(row_valid, BT), (PAD, PAD)).reshape(RH, 1)

    def prep_w(w):
        # torch (out, in, k) -> (k, in, out); pad channels; stack taps on contraction.
        wt = jnp.transpose(w, (2, 1, 0)).astype(jnp.float32)          # (K, C, C)
        wt = jnp.pad(wt, ((0, 0), (0, CP - C), (0, CP - C)))          # (K, CP, CP)
        return wt.reshape(K * CP, CP).astype(jnp.bfloat16)

    def fold(bn):
        s = bn['gamma'] / jnp.sqrt(bn['var'] + eps)
        b = bn['beta'] - bn['mean'] * s
        return (jnp.pad(s, (0, CP - C)).reshape(1, CP).astype(jnp.float32),
                jnp.pad(b, (0, CP - C)).reshape(1, CP).astype(jnp.float32))

    w1_f, w2_f = prep_w(w1), prep_w(w2)
    s1, b1 = fold(bn1)
    s2, b2 = fold(bn2)

    out = pl.pallas_call(
        basic_block2_kernel,
        out_shape=jax.ShapeDtypeStruct((NB, R, CP), jnp.float32),
        grid_spec=pltpu.PrefetchScalarGridSpec(
            num_scalar_prefetch=0,
            grid=(NB,),
            in_specs=[
                pl.BlockSpec((1, RB, CP), lambda n: (n, 0, 0)),       # x slab
                pl.BlockSpec((RH, 1), lambda n: (0, 0)),              # row mask
                pl.BlockSpec((K * CP, CP), lambda n: (0, 0)),         # w1 (fused taps)
                pl.BlockSpec((K * CP, CP), lambda n: (0, 0)),         # w2 (fused taps)
                pl.BlockSpec((1, CP), lambda n: (0, 0)),              # s1
                pl.BlockSpec((1, CP), lambda n: (0, 0)),              # b1
                pl.BlockSpec((1, CP), lambda n: (0, 0)),              # s2
                pl.BlockSpec((1, CP), lambda n: (0, 0)),              # b2
            ],
            out_specs=pl.BlockSpec((1, R, CP), lambda n: (n, 0, 0)),
        ),
        compiler_params=pltpu.CompilerParams(
            dimension_semantics=("parallel",),
            vmem_limit_bytes=64 * 1024 * 1024),
    )(xp, mask, w1_f, w2_f, s1, b1, s2, b2)

    # Drop batch pad, per-sample pad rows and channel pad; back to NCL.
    out = out.reshape(NP, LP, CP)[:N, PAD:PAD + L, :C]
    return jnp.transpose(out, (0, 2, 1))


if __name__ == "__main__":
    # Small deterministic setup: inplanes = planes = 8, stride = 1, no downsample.
    N, C, L = 2, 8, 16
    key = jax.random.PRNGKey(0)
    kx, kw1, kw2, kg1, kb1, kg2, kb2, km1, kv1, km2, kv2 = jax.random.split(key, 11)

    x = jax.random.normal(kx, (N, C, L), dtype=jnp.float32)
    w1 = 0.1 * jax.random.normal(kw1, (C, C, K), dtype=jnp.float32)
    w2 = 0.1 * jax.random.normal(kw2, (C, C, K), dtype=jnp.float32)

    bn1 = dict(gamma=1.0 + 0.05 * jax.random.normal(kg1, (C,), dtype=jnp.float32),
               beta=0.05 * jax.random.normal(kb1, (C,), dtype=jnp.float32),
               mean=0.05 * jax.random.normal(km1, (C,), dtype=jnp.float32),
               var=1.0 + 0.05 * jnp.abs(jax.random.normal(kv1, (C,), dtype=jnp.float32)))
    bn2 = dict(gamma=1.0 + 0.05 * jax.random.normal(kg2, (C,), dtype=jnp.float32),
               beta=0.05 * jax.random.normal(kb2, (C,), dtype=jnp.float32),
               mean=0.05 * jax.random.normal(km2, (C,), dtype=jnp.float32),
               var=1.0 + 0.05 * jnp.abs(jax.random.normal(kv2, (C,), dtype=jnp.float32)))

    out = basic_block2(x, w1, w2, bn1, bn2)
    jax.block_until_ready(out)

    # Pure-JAX reference (eval-mode BN).  Conv operands are cast to bf16 to mirror
    # the kernel's MXU precision (accumulation stays f32); residual is f32.
    def ref(x_ncl):
        def conv(h, w):
            return jax.lax.conv_general_dilated(
                h.astype(jnp.bfloat16), w.astype(jnp.bfloat16),
                window_strides=(1,), padding=[(PAD, PAD)],
                dimension_numbers=('NCH', 'OIH', 'NCH'),
                preferred_element_type=jnp.float32)
        def bn(h, p):
            s = p['gamma'] / jnp.sqrt(p['var'] + EPS)
            b = p['beta'] - p['mean'] * s
            return h * s[None, :, None] + b[None, :, None]
        h = jax.nn.relu(bn(conv(x_ncl, w1), bn1))
        h = bn(conv(h, w2), bn2) + x_ncl
        return jax.nn.relu(h)

    ref_out = ref(x)
    # Tolerance covers bf16 operand rounding differences between the kernel's
    # explicit matmuls and XLA's conv.
    assert jnp.allclose(out, ref_out, atol=3e-2, rtol=3e-2), "mismatch vs reference"

    print("KERNEL_OK")
</pallas_src>

<mosaic_0001>
module attributes {stable_mosaic.version = 11 : i64} {
  func.func @basic_block2_kernel(%arg0: i32, %arg1: memref<1x56x128xf32, #tpu.memory_space<vmem>>, %arg2: memref<44x1xf32, #tpu.memory_space<vmem>>, %arg3: memref<640x128xbf16, #tpu.memory_space<vmem>>, %arg4: memref<640x128xbf16, #tpu.memory_space<vmem>>, %arg5: memref<1x128xf32, #tpu.memory_space<vmem>>, %arg6: memref<1x128xf32, #tpu.memory_space<vmem>>, %arg7: memref<1x128xf32, #tpu.memory_space<vmem>>, %arg8: memref<1x128xf32, #tpu.memory_space<vmem>>, %arg9: memref<1x40x128xf32, #tpu.memory_space<vmem>>) attributes {dimension_semantics = [#tpu.dimension_semantics<parallel>], iteration_bounds = array<i64: 1>, scalar_prefetch = 0 : i64, scratch_operands = 0 : i64, tpu.core_type = #tpu.core_type<tc>, window_params = [{transform_indices = @transform_0, window_bounds = array<i64: 1, 56, 128>}, {pipeline_mode = #tpu.pipeline_mode<synchronous>, transform_indices = @transform_1, window_bounds = array<i64: 44, 1>}, {pipeline_mode = #tpu.pipeline_mode<synchronous>, transform_indices = @transform_2, window_bounds = array<i64: 640, 128>}, {pipeline_mode = #tpu.pipeline_mode<synchronous>, transform_indices = @transform_3, window_bounds = array<i64: 640, 128>}, {pipeline_mode = #tpu.pipeline_mode<synchronous>, transform_indices = @transform_4, window_bounds = array<i64: 1, 128>}, {pipeline_mode = #tpu.pipeline_mode<synchronous>, transform_indices = @transform_5, window_bounds = array<i64: 1, 128>}, {pipeline_mode = #tpu.pipeline_mode<synchronous>, transform_indices = @transform_6, window_bounds = array<i64: 1, 128>}, {pipeline_mode = #tpu.pipeline_mode<synchronous>, transform_indices = @transform_7, window_bounds = array<i64: 1, 128>}, {transform_indices = @transform_8, window_bounds = array<i64: 1, 40, 128>}]} {
    %c0 = arith.constant 0 : index
    %c0_0 = arith.constant 0 : index
    %c0_1 = arith.constant 0 : index
    %0 = vector.load %arg1[%c0, %c0_0, %c0_1] : memref<1x56x128xf32, #tpu.memory_space<vmem>>, vector<1x56x128xf32>
    %1 = vector.shape_cast %0 : vector<1x56x128xf32> to vector<56x128xf32>
    %2 = arith.truncf %1 : vector<56x128xf32> to vector<56x128xbf16>
    %3 = vector.extract_strided_slice %2 {offsets = [4, 0], sizes = [44, 128], strides = [1, 1]} : vector<56x128xbf16> to vector<44x128xbf16>
    %4 = vector.extract_strided_slice %2 {offsets = [5, 0], sizes = [44, 128], strides = [1, 1]} : vector<56x128xbf16> to vector<44x128xbf16>
    %5 = vector.extract_strided_slice %2 {offsets = [6, 0], sizes = [44, 128], strides = [1, 1]} : vector<56x128xbf16> to vector<44x128xbf16>
    %6 = vector.extract_strided_slice %2 {offsets = [7, 0], sizes = [44, 128], strides = [1, 1]} : vector<56x128xbf16> to vector<44x128xbf16>
    %7 = vector.extract_strided_slice %2 {offsets = [8, 0], sizes = [44, 128], strides = [1, 1]} : vector<56x128xbf16> to vector<44x128xbf16>
    %8 = tpu.concatenate %3, %4, %5, %6, %7 in 1 : vector<44x128xbf16>, vector<44x128xbf16>, vector<44x128xbf16>, vector<44x128xbf16>, vector<44x128xbf16> -> vector<44x640xbf16>
    %c0_2 = arith.constant 0 : index
    %c0_3 = arith.constant 0 : index
    %9 = vector.load %arg3[%c0_2, %c0_3] : memref<640x128xbf16, #tpu.memory_space<vmem>>, vector<640x128xbf16>
    %cst = arith.constant dense<0.000000e+00> : vector<44x128xf32>
    %10 = tpu.matmul %8, %9, %cst {dimension_numbers = #tpu.dot_dimension_numbers<[1], [0], [0], [1], [0, 0, 1, 1], [], []>} : vector<44x640xbf16>, vector<640x128xbf16>, vector<44x128xf32> -> vector<44x128xf32>
    %c0_4 = arith.constant 0 : index
    %c0_5 = arith.constant 0 : index
    %11 = vector.load %arg5[%c0_4, %c0_5] : memref<1x128xf32, #tpu.memory_space<vmem>>, vector<1x128xf32>
    %12 = vector.shape_cast %11 : vector<1x128xf32> to vector<128xf32>
    %13 = vector.shape_cast %12 : vector<128xf32> to vector<1x128xf32>
    %14 = vector.broadcast %13 : vector<1x128xf32> to vector<44x128xf32>
    %15 = arith.mulf %10, %14 : vector<44x128xf32>
    %c0_6 = arith.constant 0 : index
    %c0_7 = arith.constant 0 : index
    %16 = vector.load %arg6[%c0_6, %c0_7] : memref<1x128xf32, #tpu.memory_space<vmem>>, vector<1x128xf32>
    %17 = vector.shape_cast %16 : vector<1x128xf32> to vector<128xf32>
    %18 = vector.shape_cast %17 : vector<128xf32> to vector<1x128xf32>
    %19 = vector.broadcast %18 : vector<1x128xf32> to vector<44x128xf32>
    %20 = arith.addf %15, %19 : vector<44x128xf32>
    %cst_8 = arith.constant 0.000000e+00 : f32
    %21 = vector.broadcast %cst_8 : f32 to vector<44x128xf32>
    %22 = arith.maximumf %20, %21 : vector<44x128xf32>
    %c0_9 = arith.constant 0 : index
    %c0_10 = arith.constant 0 : index
    %23 = vector.load %arg2[%c0_9, %c0_10] : memref<44x1xf32, #tpu.memory_space<vmem>>, vector<44x1xf32>
    %24 = vector.broadcast %23 : vector<44x1xf32> to vector<44x128xf32>
    %25 = arith.mulf %22, %24 : vector<44x128xf32>
    %26 = arith.truncf %25 : vector<44x128xf32> to vector<44x128xbf16>
    %27 = vector.extract_strided_slice %26 {offsets = [0, 0], sizes = [40, 128], strides = [1, 1]} : vector<44x128xbf16> to vector<40x128xbf16>
    %28 = vector.extract_strided_slice %26 {offsets = [1, 0], sizes = [40, 128], strides = [1, 1]} : vector<44x128xbf16> to vector<40x128xbf16>
    %29 = vector.extract_strided_slice %26 {offsets = [2, 0], sizes = [40, 128], strides = [1, 1]} : vector<44x128xbf16> to vector<40x128xbf16>
    %30 = vector.extract_strided_slice %26 {offsets = [3, 0], sizes = [40, 128], strides = [1, 1]} : vector<44x128xbf16> to vector<40x128xbf16>
    %31 = vector.extract_strided_slice %26 {offsets = [4, 0], sizes = [40, 128], strides = [1, 1]} : vector<44x128xbf16> to vector<40x128xbf16>
    %32 = tpu.concatenate %27, %28, %29, %30, %31 in 1 : vector<40x128xbf16>, vector<40x128xbf16>, vector<40x128xbf16>, vector<40x128xbf16>, vector<40x128xbf16> -> vector<40x640xbf16>
    %c0_11 = arith.constant 0 : index
    %c0_12 = arith.constant 0 : index
    %33 = vector.load %arg4[%c0_11, %c0_12] : memref<640x128xbf16, #tpu.memory_space<vmem>>, vector<640x128xbf16>
    %cst_13 = arith.constant dense<0.000000e+00> : vector<40x128xf32>
    %34 = tpu.matmul %32, %33, %cst_13 {dimension_numbers = #tpu.dot_dimension_numbers<[1], [0], [0], [1], [0, 0, 1, 1], [], []>} : vector<40x640xbf16>, vector<640x128xbf16>, vector<40x128xf32> -> vector<40x128xf32>
    %35 = vector.extract_strided_slice %1 {offsets = [8, 0], sizes = [40, 128], strides = [1, 1]} : vector<56x128xf32> to vector<40x128xf32>
    %c0_14 = arith.constant 0 : index
    %c0_15 = arith.constant 0 : index
    %36 = vector.load %arg7[%c0_14, %c0_15] : memref<1x128xf32, #tpu.memory_space<vmem>>, vector<1x128xf32>
    %37 = vector.shape_cast %36 : vector<1x128xf32> to vector<128xf32>
    %38 = vector.shape_cast %37 : vector<128xf32> to vector<1x128xf32>
    %39 = vector.broadcast %38 : vector<1x128xf32> to vector<40x128xf32>
    %40 = arith.mulf %34, %39 : vector<40x128xf32>
    %c0_16 = arith.constant 0 : index
    %c0_17 = arith.constant 0 : index
    %41 = vector.load %arg8[%c0_16, %c0_17] : memref<1x128xf32, #tpu.memory_space<vmem>>, vector<1x128xf32>
    %42 = vector.shape_cast %41 : vector<1x128xf32> to vector<128xf32>
    %43 = vector.shape_cast %42 : vector<128xf32> to vector<1x128xf32>
    %44 = vector.broadcast %43 : vector<1x128xf32> to vector<40x128xf32>
    %45 = arith.addf %40, %44 : vector<40x128xf32>
    %46 = arith.addf %45, %35 : vector<40x128xf32>
    %cst_18 = arith.constant 0.000000e+00 : f32
    %47 = vector.broadcast %cst_18 : f32 to vector<40x128xf32>
    %48 = arith.maximumf %46, %47 : vector<40x128xf32>
    %c0_19 = arith.constant 0 : index
    %c0_20 = arith.constant 0 : index
    %c0_21 = arith.constant 0 : index
    %49 = vector.load %arg9[%c0_19, %c0_20, %c0_21] : memref<1x40x128xf32, #tpu.memory_space<vmem>>, vector<1x40x128xf32>
    %50 = vector.shape_cast %49 : vector<1x40x128xf32> to vector<40x128xf32>
    %51 = vector.shape_cast %48 : vector<40x128xf32> to vector<1x40x128xf32>
    tpu.vector_store %arg9[%c0_19, %c0_20, %c0_21], %51 {strides = array<i32>} : memref<1x40x128xf32, #tpu.memory_space<vmem>>, vector<1x40x128xf32>,
    return
  }
  func.func @transform_0(%arg0: i32) -> (i32, i32, i32) {
    %c0_i32 = arith.constant 0 : i32
    %c0_i32_0 = arith.constant 0 : i32
    %c0_i32_1 = arith.constant 0 : i32
    return %arg0, %c0_i32, %c0_i32_0 : i32, i32, i32
  }
  func.func @transform_1(%arg0: i32) -> (i32, i32) {
    %c0_i32 = arith.constant 0 : i32
    %c0_i32_0 = arith.constant 0 : i32
    %c0_i32_1 = arith.constant 0 : i32
    return %c0_i32, %c0_i32_0 : i32, i32
  }
  func.func @transform_2(%arg0: i32) -> (i32, i32) {
    %c0_i32 = arith.constant 0 : i32
    %c0_i32_0 = arith.constant 0 : i32
    %c0_i32_1 = arith.constant 0 : i32
    return %c0_i32, %c0_i32_0 : i32, i32
  }
  func.func @transform_3(%arg0: i32) -> (i32, i32) {
    %c0_i32 = arith.constant 0 : i32
    %c0_i32_0 = arith.constant 0 : i32
    %c0_i32_1 = arith.constant 0 : i32
    return %c0_i32, %c0_i32_0 : i32, i32
  }
  func.func @transform_4(%arg0: i32) -> (i32, i32) {
    %c0_i32 = arith.constant 0 : i32
    %c0_i32_0 = arith.constant 0 : i32
    %c0_i32_1 = arith.constant 0 : i32
    return %c0_i32, %c0_i32_0 : i32, i32
  }
  func.func @transform_5(%arg0: i32) -> (i32, i32) {
    %c0_i32 = arith.constant 0 : i32
    %c0_i32_0 = arith.constant 0 : i32
    %c0_i32_1 = arith.constant 0 : i32
    return %c0_i32, %c0_i32_0 : i32, i32
  }
  func.func @transform_6(%arg0: i32) -> (i32, i32) {
    %c0_i32 = arith.constant 0 : i32
    %c0_i32_0 = arith.constant 0 : i32
    %c0_i32_1 = arith.constant 0 : i32
    return %c0_i32, %c0_i32_0 : i32, i32
  }
  func.func @transform_7(%arg0: i32) -> (i32, i32) {
    %c0_i32 = arith.constant 0 : i32
    %c0_i32_0 = arith.constant 0 : i32
    %c0_i32_1 = arith.constant 0 : i32
    return %c0_i32, %c0_i32_0 : i32, i32
  }
  func.func @transform_8(%arg0: i32) -> (i32, i32, i32) {
    %c0_i32 = arith.constant 0 : i32
    %c0_i32_0 = arith.constant 0 : i32
    %c0_i32_1 = arith.constant 0 : i32
    return %arg0, %c0_i32, %c0_i32_0 : i32, i32, i32
  }
}

</mosaic_0001>

<bundles_post_ra>
// kernel: tpu_custom_call.1
= control target key start
LH: loop header
LB: loop body
LE: loop exit
PB: predicated region body
PF: predicated region fallthrough
CT: control target
= control target key end

     0   :  { %13 = vsyncpa [#allocation3], 0  ;;  %s2299_s0 = inlined_call_operand.hbm [shape: f32[1,56,128], index: 0, kind: input, shape index: {}]   ;;  %s2300_s1 = inlined_call_operand.hbm [shape: f32[44,1], index: 1, kind: input, shape index: {}]   ;;  %s2301_s2 = inlined_call_operand.hbm [shape: bf16[640,128], index: 2, kind: input, shape index: {}]   ;;  %s2302_s3 = inlined_call_operand.hbm [shape: bf16[640,128], index: 3, kind: input, shape index: {}]   ;;  %s2303_s4 = inlined_call_operand.hbm [shape: f32[1,128], index: 4, kind: input, shape index: {}]   ;;  %s2304_s5 = inlined_call_operand.hbm [shape: f32[1,128], index: 5, kind: input, shape index: {}]   ;;  %s2305_s6 = inlined_call_operand.hbm [shape: f32[1,128], index: 6, kind: input, shape index: {}]   ;;  %s2306_s7 = inlined_call_operand.hbm [shape: f32[1,128], index: 7, kind: input, shape index: {}]   ;;  %s2307_s8 = inlined_call_operand.hbm [shape: f32[1,40,128], index: 8, kind: output, shape index: {}]  }
   0x1   :  { %14 = vsyncpa [#allocation6], 0 }
   0x2   :  { %15 = vsyncpa [#allocation9], 0 }
   0x3   :  { %16 = vsyncpa [#allocation12], 0 }
   0x4   :  { %17 = vsyncpa [#allocation15], 0 }
   0x5   :  { %18 = vsyncpa [#allocation4], 0  ;;  %s2031_s27 = smov [#allocation5]   ;;  %s1821_s9 = scalar_lea.hbm %s2300_s1, 768 }
   0x6   :  { %s36_s28 = sshll.u32 %s2031_s27, 4  ;;  %p1822_p0 = scmp.ne.s32.totalorder %s2300_s1, %s1821_s9  ;;  %s37_s28 = int_to_ptr.vmem [resolvable:$true] %s36_s28 }
   0x7   :  { %p1825_p1 = scmp.lt.u32.totalorder %s1821_s9, %s2300_s1 }
   0x9   :  { %p1827_p2 = pnand %p1825_p1, %p1822_p0 }
   0xb   :  { %1830 = shalt.err (!%p1827_p2)
}
   0xc   :  { %s1831_s14 = scalar_lea.vmem %s37_s28, 768  ;;  %p1836_p4 = scmp.lt.s32.totalorder %s37_s28, %s37_s28 }
   0xd   :  { %p1832_p3 = scmp.ne.s32.totalorder %s37_s28, %s1831_s14  ;;  %p1837_p5 = scmp.lt.s32.totalorder %s1831_s14, %s1831_s14 }
   0xf   :  { %p1838_p6 = por %p1837_p5, %p1836_p4 }
  0x11   :  { %p1839_p7 = pnand %p1838_p6, %p1832_p3 }
  0x13   :  { %1842 = shalt.err (!%p1839_p7)
}
  0x14   :  { %s2032_s15 = smov 128   ;;  %s2033_s16 = smov 8  }
  0x15   :  { %42 = dma.hbm_to_vmem [thread:$0]  %s2300_s1, 768, %s37_s28, [#allocation6], %s2032_s15, %s2032_s15, %s2033_s16  }
  0x16   :  { %s2034_s19 = smov [#allocation8]   ;;  %s2035_s21 = smov [#allocation11]  }
  0x17   :  { %s60_s20 = sshll.u32 %s2034_s19, 4  ;;  %s83_s22 = sshll.u32 %s2035_s21, 4  ;;  %s61_s20 = int_to_ptr.vmem [resolvable:$true] %s60_s20  ;;  %s84_s22 = int_to_ptr.vmem [resolvable:$true] %s83_s22 }
  0x18   :  { %s1843_s25 = scalar_lea.hbm %s2302_s3, 5120 }
  0x19   :  { %p1844_p8 = scmp.ne.s32.totalorder %s2302_s3, %s1843_s25  ;;  %p1847_p9 = scmp.lt.u32.totalorder %s1843_s25, %s2302_s3 }
  0x1b   :  { %p1849_p10 = pnand %p1847_p9, %p1844_p8 }
  0x1d   :  { %1852 = shalt.err (!%p1849_p10)
}
  0x1e   :  { %s1853_s1 = scalar_lea.vmem %s61_s20, 5120  ;;  %p1858_p12 = scmp.lt.s32.totalorder %s61_s20, %s61_s20 }
  0x1f   :  { %p1854_p11 = scmp.ne.s32.totalorder %s61_s20, %s1853_s1  ;;  %p1859_p13 = scmp.lt.s32.totalorder %s1853_s1, %s1853_s1 }
  0x21   :  { %p1860_p0 = por %p1859_p13, %p1858_p12 }
  0x23   :  { %p1861_p1 = pnand %p1860_p0, %p1854_p11 }
  0x25   :  { %1864 = shalt.err (!%p1861_p1)
}
  0x26   :  { %s2036_s28 = smov 64   ;;  %s2037_s9 = smov 4  }
  0x27   :  { %66 = dma.hbm_to_vmem [thread:$0]  %s2302_s3, 5120, %s61_s20, [#allocation9], %s2036_s28, %s2036_s28, %s2037_s9  }
  0x28   :  { %s1865_s14 = scalar_lea.hbm %s2304_s5, 16 }
  0x29   :  { %p1866_p2 = scmp.ne.s32.totalorder %s2304_s5, %s1865_s14  ;;  %p1869_p3 = scmp.lt.u32.totalorder %s1865_s14, %s2304_s5 }
  0x2b   :  { %p1871_p4 = pnand %p1869_p3, %p1866_p2 }
  0x2d   :  { %1874 = shalt.err (!%p1871_p4)
}
  0x2e   :  { %s1875_s23 = scalar_lea.vmem %s84_s22, 16  ;;  %s1879_s24 = scalar_lea.vmem %s84_s22, 32 }
  0x2f   :  { %p1876_p5 = scmp.ne.s32.totalorder %s84_s22, %s1875_s23  ;;  %p1880_p6 = scmp.lt.s32.totalorder %s84_s22, %s84_s22 }
  0x30   :  { %p1881_p7 = scmp.lt.s32.totalorder %s1879_s24, %s1875_s23 }
  0x32   :  { %p1882_p8 = por %p1881_p7, %p1880_p6 }
  0x34   :  { %p1883_p9 = pnand %p1882_p8, %p1876_p5 }
  0x36   :  { %1886 = shalt.err (!%p1883_p9)
}
  0x37   :  { %86 = dma.hbm_to_vmem [thread:$0]  %s2304_s5, 16, %s84_s22, [#allocation12]  }
  0x38   :  { %s2038_s25 = smov [#allocation2]   ;;  %s2039_s27 = smov [#allocation7]  }
  0x39   :  { %s24_s26 = sshll.u32 %s2038_s25, 4  ;;  %s48_s29 = sshll.u32 %s2039_s27, 4  ;;  %s25_s26 = int_to_ptr.vmem [resolvable:$true] %s24_s26  ;;  %s49_s29 = int_to_ptr.vmem [resolvable:$true] %s48_s29 }
  0x3a   :  { %s1887_s10 = scalar_lea.hbm %s2299_s0, 896 }
  0x3b   :  { %p1888_p10 = scmp.ne.s32.totalorder %s2299_s0, %s1887_s10  ;;  %p1891_p11 = scmp.lt.u32.totalorder %s1887_s10, %s2299_s0 }
  0x3d   :  { %p1893_p12 = pnand %p1891_p11, %p1888_p10 }
  0x3f   :  { %1896 = shalt.err (!%p1893_p12)
}
  0x40   :  { %s1897_s5 = scalar_lea.vmem %s25_s26, 896  ;;  %p1902_p0 = scmp.lt.s32.totalorder %s25_s26, %s25_s26 }
  0x41   :  { %p1898_p13 = scmp.ne.s32.totalorder %s25_s26, %s1897_s5  ;;  %p1903_p1 = scmp.lt.s32.totalorder %s1897_s5, %s1897_s5 }
  0x43   :  { %p1904_p2 = por %p1903_p1, %p1902_p0 }
  0x45   :  { %p1905_p3 = pnand %p1904_p2, %p1898_p13 }
  0x47   :  { %1908 = shalt.err (!%p1905_p3)
}
  0x48   :  { %30 = dma.hbm_to_vmem [thread:$0]  %s2299_s0, 896, %s25_s26, [#allocation3], %s2032_s15, %s2032_s15, %s2033_s16  }
  0x49   :  { %s1909_s21 = scalar_lea.hbm %s2301_s2, 5120 }
  0x4a   :  { %p1910_p4 = scmp.ne.s32.totalorder %s2301_s2, %s1909_s21  ;;  %p1913_p5 = scmp.lt.u32.totalorder %s1909_s21, %s2301_s2 }
  0x4c   :  { %p1915_p6 = pnand %p1913_p5, %p1910_p4 }
  0x4e   :  { %1918 = shalt.err (!%p1915_p6)
}
  0x4f   :  { %s1919_s25 = scalar_lea.vmem %s49_s29, 5120  ;;  %p1924_p8 = scmp.lt.s32.totalorder %s49_s29, %s49_s29 }
  0x50   :  { %p1920_p7 = scmp.ne.s32.totalorder %s49_s29, %s1919_s25  ;;  %p1925_p9 = scmp.lt.s32.totalorder %s1919_s25, %s1919_s25 }
  0x52   :  { %p1926_p10 = por %p1925_p9, %p1924_p8 }
  0x54   :  { %p1927_p11 = pnand %p1926_p10, %p1920_p7 }
  0x56   :  { %1930 = shalt.err (!%p1927_p11)
}
  0x57   :  { %54 = dma.hbm_to_vmem [thread:$0]  %s2301_s2, 5120, %s49_s29, [#allocation6], %s2036_s28, %s2036_s28, %s2037_s9  }
  0x58   :  { %s2040_s27 = smov [#allocation10]   ;;  %s2041_s1 = smov [#allocation13]  }
  0x59   :  { %s73_s30 = sshll.u32 %s2040_s27, 4  ;;  %s93_s10 = sshll.u32 %s2041_s1, 4  ;;  %s74_s30 = int_to_ptr.vmem [resolvable:$true] %s73_s30  ;;  %s94_s10 = int_to_ptr.vmem [resolvable:$true] %s93_s10 }
  0x5a   :  { %s1931_s13 = scalar_lea.hbm %s2303_s4, 16 }
  0x5b   :  { %p1932_p12 = scmp.ne.s32.totalorder %s2303_s4, %s1931_s13  ;;  %p1935_p13 = scmp.lt.u32.totalorder %s1931_s13, %s2303_s4 }
  0x5d   :  { %p1937_p0 = pnand %p1935_p13, %p1932_p12 }
  0x5f   :  { %1940 = shalt.err (!%p1937_p0)
}
  0x60   :  { %s1941_s2 = scalar_lea.vmem %s74_s30, 16  ;;  %s1945_s28 = scalar_lea.vmem %s74_s30, 32 }
  0x61   :  { %p1942_p1 = scmp.ne.s32.totalorder %s74_s30, %s1941_s2  ;;  %p1946_p2 = scmp.lt.s32.totalorder %s74_s30, %s74_s30 }
  0x62   :  { %p1947_p3 = scmp.lt.s32.totalorder %s1945_s28, %s1941_s2 }
  0x64   :  { %p1948_p4 = por %p1947_p3, %p1946_p2 }
  0x66   :  { %p1949_p5 = pnand %p1948_p4, %p1942_p1 }
  0x68   :  { %1952 = shalt.err (!%p1949_p5)
}
  0x69   :  { %76 = dma.hbm_to_vmem [thread:$0]  %s2303_s4, 16, %s74_s30, [#allocation9]  }
  0x6a   :  { %s1953_s21 = scalar_lea.hbm %s2305_s6, 16 }
  0x6b   :  { %p1954_p6 = scmp.ne.s32.totalorder %s2305_s6, %s1953_s21  ;;  %p1957_p7 = scmp.lt.u32.totalorder %s1953_s21, %s2305_s6 }
  0x6d   :  { %p1959_p8 = pnand %p1957_p7, %p1954_p6 }
  0x6f   :  { %1962 = shalt.err (!%p1959_p8)
}
  0x70   :  { %s1963_s25 = scalar_lea.vmem %s94_s10, 16  ;;  %s1967_s0 = scalar_lea.vmem %s94_s10, 32 }
  0x71   :  { %p1964_p9 = scmp.ne.s32.totalorder %s94_s10, %s1963_s25  ;;  %p1968_p10 = scmp.lt.s32.totalorder %s94_s10, %s94_s10 }
  0x72   :  { %p1969_p11 = scmp.lt.s32.totalorder %s1967_s0, %s1963_s25 }
  0x74   :  { %p1970_p12 = por %p1969_p11, %p1968_p10 }
  0x76   :  { %p1971_p13 = pnand %p1970_p12, %p1964_p9 }
  0x78   :  { %1974 = shalt.err (!%p1971_p13)
}
  0x79   :  { %96 = dma.hbm_to_vmem [thread:$0]  %s2305_s6, 16, %s94_s10, [#allocation12]  }
  0x7a   :  { %s2042_s27 = smov [#allocation14]   ;;  %s1975_s12 = scalar_lea.hbm %s2306_s7, 16 }
  0x7b   :  { %s103_s30 = sshll.u32 %s2042_s27, 4  ;;  %p1976_p0 = scmp.ne.s32.totalorder %s2306_s7, %s1975_s12  ;;  %s104_s30 = int_to_ptr.vmem [resolvable:$true] %s103_s30 }
  0x7c   :  { %p1979_p1 = scmp.lt.u32.totalorder %s1975_s12, %s2306_s7 }
  0x7e   :  { %p1981_p2 = pnand %p1979_p1, %p1976_p0 }
  0x80   :  { %1984 = shalt.err (!%p1981_p2)
}
  0x81   :  { %s1985_s17 = scalar_lea.vmem %s104_s30, 16  ;;  %s1989_s6 = scalar_lea.vmem %s104_s30, 32 }
  0x82   :  { %p1986_p3 = scmp.ne.s32.totalorder %s104_s30, %s1985_s17  ;;  %p1990_p4 = scmp.lt.s32.totalorder %s104_s30, %s104_s30 }
  0x83   :  { %p1991_p5 = scmp.lt.s32.totalorder %s1989_s6, %s1985_s17 }
  0x85   :  { %p1992_p6 = por %p1991_p5, %p1990_p4 }
  0x87   :  { %p1993_p7 = pnand %p1992_p6, %p1986_p3 }
  0x89   :  { %1996 = shalt.err (!%p1993_p7)
}
  0x8a   :  { %106 = dma.hbm_to_vmem [thread:$0]  %s2306_s7, 16, %s104_s30, [#allocation15]  }
  0x8b   :  { %2019 = dma.done.wait [#allocation3], 896  }
  0x8c   :  { %2020 = vsyncadd [#allocation3], 4294966400 }
  0x8d   :  { %2021 = dma.done.wait [#allocation6], 5888  }
  0x8e   :  { %2022 = vsyncadd [#allocation6], 4294961408 }
  0x8f   :  { %2023 = dma.done.wait [#allocation9], 5136  }
  0x90   :  { %2024 = vsyncadd [#allocation9], 4294962160 }
  0x91   :  { %2025 = dma.done.wait [#allocation12], 32  }
  0x92   :  { %2026 = vsyncadd [#allocation12], 4294967264 }
  0x93   :  { %2027 = dma.done.wait [#allocation15], 16  }
  0x94   :  { %2028 = vsyncadd [#allocation15], 4294967280  ;;  %v2043_v0 = vmov 0   ;;  %v1736_v1 = vld [vmem:[#allocation7 + $0x40] sm:$0xff]   ;;  %v1740_v5 = vld [vmem:[#allocation7 + $0x48] sm:$0xff]   ;;  %vm202_vm1 = vcmask 1045504  }
  0x95   :  { %1734 = vset.pattern.permute.xlu0 %v2043_v0  ;;  %1735 = vset.pattern.permute.xlu1 %v2043_v0  ;;  %v1737_v2 = vld [vmem:[#allocation7 + $0xc0] sm:$0xff]   ;;  %v1741_v6 = vld [vmem:[#allocation7 + $0xc8] sm:$0xff]   ;;  %v1744_v9 = vld [vmem:[#allocation7 + $0x50] sm:$0xff]   ;;  %vm143_vm0 = vsmask.f32 7424  ;;  %vm176_vm2 = vcmask 1046528  }
  0x96   :  { %1504 = vmatprep.subr.bf16.mxu0 %v1736_v1  ;;  %v1738_v3 = vld [vmem:[#allocation7] sm:$0xff]   ;;  %1538 = vmatprep.subr.bf16.mxu1 %v1737_v2  ;;  %v1742_v7 = vld [vmem:[#allocation7 + $0x8] sm:$0xff]   ;;  %v1745_v10 = vld [vmem:[#allocation7 + $0xd0] sm:$0xff]   ;;  %v2044_v40 = vmov 0.0   ;;  %vm184_vm3 = vsmask.f32 6400 }
  0x97   :  { %v1739_v4 = vld [vmem:[#allocation7 + $0x80] sm:$0xff]   ;;  %1505 = vmatpush3.bf16.msra.mxu0 %v1738_v3  ;;  %v1743_v8 = vld [vmem:[#allocation7 + $0x88] sm:$0xff]   ;;  %v1746_v11 = vld [vmem:[#allocation7 + $0x10] sm:$0xff]   ;;  %vm2045_vm4 = vmmov 0   ;;  %s2046_s7 = smov [#allocation16]  }
  0x98   :  { %1539 = vmatpush3.bf16.msra.mxu1 %v1739_v4  ;;  %1506 = vmatprep.subr.bf16.mxu0 %v1740_v5  ;;  %v1747_v12 = vld [vmem:[#allocation7 + $0x90] sm:$0xff]   ;;  %v1748_v13 = vld [vmem:[#allocation7 + $0x58] sm:$0xff]   ;;  %v1752_v17 = vld [vmem:[#allocation7 + $0x60] sm:$0xff]   ;;  %s1404_s28 = sshll.u32 %s2046_s7, 4  ;;  %s1405_s28 = int_to_ptr.vmem [resolvable:$true] %s1404_s28 }
  0x99   :  { %1540 = vmatprep.subr.bf16.mxu1 %v1741_v6  ;;  %v1749_v14 = vld [vmem:[#allocation7 + $0xd8] sm:$0xff]   ;;  %v1753_v18 = vld [vmem:[#allocation7 + $0xe0] sm:$0xff]   ;;  %v1756_v21 = vld [vmem:[#allocation7 + $0x68] sm:$0xff]   ;;  %s1997_s9 = scalar_lea.vmem %s1405_s28, 640  ;;  %p2002_p9 = scmp.lt.s32.totalorder %s1405_s28, %s1405_s28 }
  0x9a   :  { %v1750_v15 = vld [vmem:[#allocation7 + $0x18] sm:$0xff]   ;;  %v1754_v19 = vld [vmem:[#allocation7 + $0x20] sm:$0xff]   ;;  %v1757_v22 = vld [vmem:[#allocation7 + $0xe8] sm:$0xff]   ;;  %p1998_p8 = scmp.ne.s32.totalorder %s1405_s28, %s1997_s9  ;;  %p2003_p10 = scmp.lt.s32.totalorder %s1997_s9, %s1997_s9 }
  0x9b   :  { %1507 = vmatpush3.bf16.msra.mxu0 %v1742_v7  ;;  %v1751_v16 = vld [vmem:[#allocation7 + $0x98] sm:$0xff]   ;;  %v1755_v20 = vld [vmem:[#allocation7 + $0xa0] sm:$0xff]   ;;  %v1758_v23 = vld [vmem:[#allocation7 + $0x28] sm:$0xff]  }
  0x9c   :  { %1541 = vmatpush3.bf16.msra.mxu1 %v1743_v8  ;;  %1508 = vmatprep.subr.bf16.mxu0 %v1744_v9  ;;  %v1759_v24 = vld [vmem:[#allocation7 + $0xa8] sm:$0xff]   ;;  %v1760_v25 = vld [vmem:[#allocation7 + $0x70] sm:$0xff]   ;;  %v1764_v29 = vld [vmem:[#allocation7 + $0x78] sm:$0xff]   ;;  %p2004_p11 = por %p2003_p10, %p2002_p9 }
  0x9d   :  { %1542 = vmatprep.subr.bf16.mxu1 %v1745_v10  ;;  %v1761_v26 = vld [vmem:[#allocation7 + $0xf0] sm:$0xff]   ;;  %v1765_v30 = vld [vmem:[#allocation7 + $0xf8] sm:$0xff]   ;;  %v133_v34 = vld [vmem:[#allocation2 + $0x8] sm:$0xff] }
  0x9e   :  { %v1762_v27 = vld [vmem:[#allocation7 + $0x30] sm:$0xff]   ;;  %v1766_v31 = vld [vmem:[#allocation7 + $0x38] sm:$0xff]   ;;  %v134_v35 = vld [vmem:[#allocation2 + $0x10] sm:$0xff]  ;;  %p2005_p12 = pnand %p2004_p11, %p1998_p8 }
  0x9f   :  { %1509 = vmatpush3.bf16.msra.mxu0 %v1746_v11  ;;  %v1763_v28 = vld [vmem:[#allocation7 + $0xb0] sm:$0xff]   ;;  %v1767_v32 = vld [vmem:[#allocation7 + $0xb8] sm:$0xff]   ;;  %v137_v38 = vld [vmem:[#allocation2 + $0x28] sm:$0xff] }
  0xa0   :  { %1543 = vmatpush3.bf16.msra.mxu1 %v1747_v12  ;;  %1510 = vmatprep.subr.bf16.mxu0 %v1748_v13  ;;  %v132_v33 = vld [vmem:[#allocation2] sm:$0xff]  ;;  %v135_v36 = vld [vmem:[#allocation2 + $0x18] sm:$0xff]  ;;  %v138_v6 = vld [vmem:[#allocation2 + $0x30] sm:$0xff] }
  0xa1   :  { %1544 = vmatprep.subr.bf16.mxu1 %v1749_v14  ;;  %v136_v37 = vld [vmem:[#allocation2 + $0x20] sm:$0xff]  ;;  %v139_v39 = vpack.c.bf16 %v133_v34, %v132_v33  ;;  %v2201_v41 = vpack.c.bf16 %v135_v36, %v134_v35  ;;  %v771_v36 = vld [vmem:[#allocation5 + $0x18] sm:$0xff] }
  0xa2   :  { %v2203_v42 = vpack.c.bf16 %v137_v38, %v136_v37  ;;  %v1770_v38 = vld [vmem:[#allocation7 + $0x110] sm:$0xff]  }
  0xa3   :  { %1511 = vmatpush3.bf16.msra.mxu0 %v1750_v15  ;;  %v145_v43 = vshrl.u32 %v139_v39, 16  ;;  %v147_v44 = vshll.u32 %v139_v39, 16  ;;  %v203_v45 = vrot.slane %v139_v39, 2  ;;  %v177_v46 = vrot.slane %v139_v39, 1 }
  0xa4   :  { %1545 = vmatpush3.bf16.msra.mxu1 %v1751_v16  ;;  %1512 = vmatprep.subr.bf16.mxu0 %v1752_v17  ;;  %v152_v47 = vshll.u32 %v2201_v41, 16  ;;  %v156_v48 = vshrl.u32 %v2201_v41, 16  ;;  %v160_v49 = vshll.u32 %v2203_v42, 16  ;;  %v164_v50 = vshrl.u32 %v2203_v42, 16 }
  0xa5   :  { %1546 = vmatprep.subr.bf16.mxu1 %v1753_v18  ;;  %v149_v51 = vrot.slane %v147_v44, 1  ;;  %v185_v52 = vrot.slane %v145_v43, 1  ;;  %v186_v53 = vrot.slane %v147_v44, 2  ;;  %v204_v54 = vrot.slane %v2201_v41, 2  ;;  %v1768_v18 = vld [vmem:[#allocation7 + $0x100] sm:$0xff]  }
  0xa6   :  { %v154_v55 = vrot.slane %v152_v47, 1  ;;  %v162_v56 = vrot.slane %v160_v49, 1  ;;  %v188_v57 = vrot.slane %v156_v48, 1  ;;  %v189_v58 = vrot.slane %v152_v47, 2 }
  0xa7   :  { %1513 = vmatpush3.bf16.msra.mxu0 %v1754_v19  ;;  %v150_v59 = vor.u32 %v149_v51, %v145_v43  ;;  %v187_v60 = vor.u32 %v186_v53, %v185_v52  ;;  %v192_v61 = vrot.slane %v164_v50, 1  ;;  %v193_v62 = vrot.slane %v160_v49, 2  ;;  %v1771_v53 = vld [vmem:[#allocation7 + $0x118] sm:$0xff]  }
  0xa8   :  { %1547 = vmatpush3.bf16.msra.mxu1 %v1755_v20  ;;  %1514 = vmatprep.subr.bf16.mxu0 %v1756_v21  ;;  %v158_v63 = vor.u32 %v156_v48, %v154_v55  ;;  %v190_v0 = vor.u32 %v189_v58, %v188_v57  ;;  %v178_v1 = vrot.slane %v2201_v41, 1  ;;  %v2215_v4 = vsel %vm202_vm1, %v203_v45, %v204_v54  ;;  %v1772_v41 = vld [vmem:[#allocation7 + $0x120] sm:$0xff]   ;;  %v1774_v57 = vld [vmem:[#allocation7 + $0x130] sm:$0xff]   ;;  %v1775_v58 = vld [vmem:[#allocation7 + $0x138] sm:$0xff]  }
  0xa9   :  { %1548 = vmatprep.subr.bf16.mxu1 %v1757_v22  ;;  %v155_v2 = vsel %vm143_vm0, %v150_v59, %v154_v55  ;;  %v194_v3 = vor.u32 %v193_v62, %v192_v61  ;;  %v180_v5 = vrot.slane %v2203_v42, 1  ;;  %v2223_v19 = vpack.c.bf16 %v138_v6, %v138_v6  ;;  %v768_v22 = vld [vmem:[#allocation5] sm:$0xff]  ;;  %v773_v55 = vld [vmem:[#allocation5 + $0x28] sm:$0xf] }
  0xaa   :  { %v163_v7 = vsel %vm143_vm0, %v158_v63, %v162_v56  ;;  %v290_v8 = vrot.slane %v155_v2, 2  ;;  %v191_v9 = vsel %vm184_vm3, %v187_v60, %v190_v0  ;;  %v179_v10 = vsel %vm176_vm2, %v177_v46, %v178_v1  ;;  %776 = vperm.xlu0 %1734, %v768_v22   ;;  %v772_v46 = vld [vmem:[#allocation5 + $0x20] sm:$0xff]  ;;  %v1776_v63 = vld [vmem:[#allocation8 + $0x40] sm:$0xff]   ;;  %v1779_v2 = vld [vmem:[#allocation8 + $0x48] sm:$0xff]  }
  0xab   :  { %1515 = vmatpush3.bf16.msra.mxu0 %v1758_v23  ;;  %v291_v11 = vrot.slane %v163_v7, 2  ;;  %v195_v12 = vsel %vm184_vm3, %v190_v0, %v194_v3  ;;  %v296_v13 = vrot.slane %v191_v9, 2  ;;  %v181_v14 = vsel %vm176_vm2, %v178_v1, %v180_v5  ;;  %v1777_v0 = vld [vmem:[#allocation8] sm:$0xff]   ;;  %v1783_v6 = vld [vmem:[#allocation8 + $0x50] sm:$0xff]   ;;  %v1784_v7 = vld [vmem:[#allocation8 + $0x88] sm:$0xff]  }
  0xac   :  { %1549 = vmatpush3.bf16.msra.mxu1 %v1759_v24  ;;  %1516 = vmatprep.subr.bf16.mxu0 %v1760_v25  ;;  %v297_v15 = vrot.slane %v195_v12, 2  ;;  %v293_v16 = vrot.slane %v179_v10, 2  ;;  %v294_v17 = vrot.slane %v181_v14, 2  ;;  %v166_v21 = vor.u32 %v164_v50, %v162_v56  ;;  %v1778_v1 = vld [vmem:[#allocation8 + $0xc0] sm:$0xff]   ;;  %v1786_v9 = vld [vmem:[#allocation8 + $0xd0] sm:$0xff]   ;;  %v1787_v10 = vld [vmem:[#allocation8 + $0x58] sm:$0xff]  }
  0xad   :  { %1550 = vmatprep.subr.bf16.mxu1 %v1761_v26  ;;  %v292_v20 = vsel %vm202_vm1, %v290_v8, %v291_v11  ;;  %v168_v25 = vshll.u32 %v2223_v19, 16  ;;  %v196_v26 = vshrl.u32 %v2223_v19, 16  ;;  %v1785_v8 = vld [vmem:[#allocation8 + $0x10] sm:$0xff]   ;;  %v1789_v12 = vld [vmem:[#allocation8 + $0x18] sm:$0xff]   ;;  %v1791_v14 = vld [vmem:[#allocation8 + $0x60] sm:$0xff]  }
  0xae   :  { %597 = vmatprep.mubr.bf16.mxu0 %v292_v20  ;;  %v298_v23 = vsel %vm202_vm1, %v296_v13, %v297_v15  ;;  %v295_v24 = vsel %vm202_vm1, %v293_v16, %v294_v17  ;;  %v1790_v13 = vld [vmem:[#allocation8 + $0xd8] sm:$0xff]   ;;  %v1793_v16 = vld [vmem:[#allocation8 + $0x20] sm:$0xff]   ;;  %v1797_v20 = vld [vmem:[#allocation8 + $0x28] sm:$0xff]  }
  0xaf   :  { %1517 = vmatpush3.bf16.msra.mxu0 %v1762_v27  ;;  %v770_v27 = vld [vmem:[#allocation5 + $0x10] sm:$0xff]  ;;  %654 = vmatprep.mubr.bf16.mxu1 %v298_v23  ;;  %v170_v33 = vrot.slane %v168_v25, 1  ;;  %v198_v34 = vrot.slane %v196_v26, 1  ;;  %v199_v35 = vrot.slane %v168_v25, 2  ;;  %v1799_v22 = vld [vmem:[#allocation8 + $0x70] sm:$0xff]   ;;  %v1800_v23 = vld [vmem:[#allocation8 + $0xa8] sm:$0xff]  }
  0xb0   :  { %1551 = vmatpush3.bf16.msra.mxu1 %v1763_v28  ;;  %1518 = vmatprep.subr.bf16.mxu0 %v1764_v29  ;;  %v299_v28 = vrot.slane %v2215_v4, 2  ;;  %v1769_v29 = vld [vmem:[#allocation7 + $0x108] sm:$0xff]   ;;  %v1802_v25 = vld [vmem:[#allocation8 + $0xf0] sm:$0xff]   ;;  %v1803_v26 = vld [vmem:[#allocation8 + $0x78] sm:$0xff]  }
  0xb1   :  { %1552 = vmatprep.subr.bf16.mxu1 %v1765_v30  ;;  %v206_v30 = vrot.slane %v2203_v42, 2  ;;  %786 = vperm.xlu1 %1735, %v770_v27   ;;  %v171_v39 = vsel %vm143_vm0, %v166_v21, %v170_v33  ;;  %v200_v43 = vor.u32 %v199_v35, %v198_v34  ;;  %v208_v42 = vrot.slane %v2223_v19, 2  ;;  %v1798_v21 = vld [vmem:[#allocation8 + $0xe8] sm:$0xff]   ;;  %v1804_v27 = vld [vmem:[#allocation8 + $0xb0] sm:$0xff]  }
  0xb2   :  { %v302_v45 = vrot.slane %v171_v39, 2 }
  0xb3   :  { %1519 = vmatpush3.bf16.msra.mxu0 %v1766_v31  ;;  %v182_v31 = vrot.slane %v2223_v19, 1  ;;  %v201_v47 = vsel %vm184_vm3, %v194_v3, %v200_v43  ;;  %v207_v48 = vsel %vm202_vm1, %v204_v54, %v206_v30  ;;  %v1773_v54 = vld [vmem:[#allocation7 + $0x128] sm:$0xff]   ;;  %v209_v60 = vsel %vm202_vm1, %v206_v30, %v208_v42  ;;  %v1780_v3 = vld [vmem:[#allocation8 + $0x80] sm:$0xff]  }
  0xb4   :  { %1553 = vmatpush3.bf16.msra.mxu1 %v1767_v32  ;;  %1662 = vmatprep.subr.bf16.mxu0 %v2044_v40  ;;  %v769_v32 = vld [vmem:[#allocation5 + $0x8] sm:$0xff]  ;;  %v303_v49 = vsel %vm202_vm1, %v291_v11, %v302_v45  ;;  %v306_v50 = vrot.slane %v201_v47, 2  ;;  %v300_v51 = vrot.slane %v207_v48, 2  ;;  %v308_v61 = vrot.slane %v209_v60, 2  ;;  %v1788_v11 = vld [vmem:[#allocation8 + $0x90] sm:$0xff]   ;;  %v1796_v19 = vld [vmem:[#allocation8 + $0xa0] sm:$0xff]  }
  0xb5   :  { %v183_v37 = vsel %vm176_vm2, %v180_v5, %v182_v31  ;;  %781 = vperm.xlu0 %1734, %v769_v32   ;;  %791 = vperm.xlu1 %1735, %v771_v36   ;;  %v1782_v5 = vld [vmem:[#allocation8 + $0xc8] sm:$0xff]  }
  0xb6   :  { %598 = vmatmul.mubr.bf16.vlgmr.msra.gmra.mrb[0].mxu0 %v2215_v4  ;;  %v304_v44 = vrot.slane %v183_v37, 2  ;;  %v307_v56 = vsel %vm202_vm1, %v297_v15, %v306_v50  ;;  %v301_v59 = vsel %vm202_vm1, %v299_v28, %v300_v51  ;;  %v309_v62 = vsel %vm202_vm1, %v300_v51, %v308_v61  ;;  %1583 = vmatprep.subr.bf16.mxu1 %v1776_v63  ;;  %v1781_v4 = vld [vmem:[#allocation8 + $0x8] sm:$0xff]   ;;  %v1792_v15 = vld [vmem:[#allocation8 + $0x98] sm:$0xff]  }
  0xb7   :  { %655 = vmatmul.mubr.bf16.vlgmr.msra.gmra.mrb[0].mxu1 %v295_v24  ;;  %1663 = vmatpush3.bf16.msra.mxu0 %v1768_v18  ;;  %v1795_v18 = vld [vmem:[#allocation8 + $0x68] sm:$0xff]   ;;  %v1801_v24 = vld [vmem:[#allocation8 + $0x30] sm:$0xff]   ;;  %v1805_v28 = vld [vmem:[#allocation8 + $0x38] sm:$0xff]  }
  0xb8   :  { %1664 = vmatprep.subr.bf16.mxu0 %v2044_v40  ;;  %605 = vmatprep.mubr.bf16.mxu0 %v303_v49  ;;  %v305_v52 = vsel %vm202_vm1, %v294_v17, %v304_v44  ;;  %v1794_v17 = vld [vmem:[#allocation8 + $0xe0] sm:$0xff]  }
  0xb9   :  { %796 = vperm.xlu0 %1734, %v772_v46   ;;  %662 = vmatprep.mubr.bf16.mxu1 %v307_v56 }
  0xba   :  { %801 = vperm.xlu1 %1735, %v773_v55   ;;  %1584 = vmatpush3.bf16.msra.mxu1 %v1777_v0 }
  0xbb   :  { %1665 = vmatpush3.bf16.msra.mxu0 %v1769_v29  ;;  %1585 = vmatprep.subr.bf16.mxu1 %v1779_v2  ;;  %v1806_v29 = vld [vmem:[#allocation8 + $0xf8] sm:$0xff]  }
  0xbc   :  { %1666 = vmatprep.subr.bf16.mxu0 %v2044_v40 }
  0xbe   :  { %606 = vmatmul.mubr.bf16.gmra.mrb[4].mxu0 %v207_v48  ;;  %1586 = vmatpush3.bf16.msra.mxu1 %v1781_v4 }
  0xbf   :  { %1667 = vmatpush3.bf16.msra.mxu0 %v1770_v38  ;;  %663 = vmatmul.mubr.bf16.gmra.mrb[4].mxu1 %v305_v52 }
  0xc0   :  { %1668 = vmatprep.subr.bf16.mxu0 %v2044_v40  ;;  %613 = vmatprep.mubr.bf16.mxu0 %v302_v45 }
  0xc1   :  { %670 = vmatprep.mubr.bf16.mxu1 %v306_v50  ;;  %1587 = vmatprep.subr.bf16.mxu1 %v1783_v6 }
  0xc2   :  { %1588 = vmatpush3.bf16.msra.mxu1 %v1785_v8 }
  0xc3   :  { %1669 = vmatpush3.bf16.msra.mxu0 %v1771_v53  ;;  %1589 = vmatprep.subr.bf16.mxu1 %v1787_v10 }
  0xc4   :  { %1670 = vmatprep.subr.bf16.mxu0 %v2044_v40 }
  0xc6   :  { %614 = vmatmul.mubr.bf16.gmra.mrb[8].mxu0 %v206_v30  ;;  %1590 = vmatpush3.bf16.msra.mxu1 %v1789_v12  ;;  %v1807_v30 = vld [vmem:[#allocation8 + $0xb8] sm:$0xff]  }
  0xc7   :  { %1671 = vmatpush3.bf16.msra.mxu0 %v1772_v41  ;;  %1678 = vmatprep.mubr.msk.bf16.mxu0 %vm2045_vm4, %v2044_v40 }
  0xc8   :  { %1672 = vmatprep.subr.bf16.mxu0 %v2044_v40  ;;  %671 = vmatmul.mubr.bf16.gmra.mrb[8].mxu1 %v304_v44 }
  0xc9   :  { %1591 = vmatprep.subr.bf16.mxu1 %v1791_v14 }
  0xca   :  { %1592 = vmatpush3.bf16.msra.mxu1 %v1793_v16 }
  0xcb   :  { %1673 = vmatpush3.bf16.msra.mxu0 %v1773_v54  ;;  %1593 = vmatprep.subr.bf16.mxu1 %v1795_v18 }
  0xcc   :  { %1674 = vmatprep.subr.bf16.mxu0 %v2044_v40 }
  0xce   :  { %1594 = vmatpush3.bf16.msra.mxu1 %v1797_v20 }
  0xcf   :  { %1675 = vmatpush3.bf16.msra.mxu0 %v1774_v57  ;;  %1595 = vmatprep.subr.bf16.mxu1 %v1799_v22 }
  0xd0   :  { %1676 = vmatprep.subr.bf16.mxu0 %v2044_v40 }
  0xd2   :  { %1596 = vmatpush3.bf16.msra.mxu1 %v1801_v24 }
  0xd3   :  { %1677 = vmatpush3.bf16.msra.mxu0 %v1775_v58  ;;  %1597 = vmatprep.subr.bf16.mxu1 %v1803_v26 }
  0xd4   :  { %1617 = vmatprep.subr.bf16.mxu0 %v1778_v1 }
  0xd6   :  { %1679 = vmatmul.mubr.bf16.vlgmr.msra.gmra.mrb[12].mxu0 %v301_v59  ;;  %1598 = vmatpush3.bf16.msra.mxu1 %v1805_v28 }
  0xd7   :  { %1682 = vmatprep.mubr.msk.bf16.mxu0 %vm2045_vm4, %v2044_v40  ;;  %1618 = vmatpush3.bf16.msra.mxu0 %v1780_v3 }
  0xd8   :  { %1619 = vmatprep.subr.bf16.mxu0 %v1782_v5  ;;  %1690 = vmatprep.subr.bf16.mxu1 %v2044_v40 }
  0xdb   :  { %1620 = vmatpush3.bf16.msra.mxu0 %v1784_v7 }
  0xdc   :  { %1621 = vmatprep.subr.bf16.mxu0 %v1786_v9 }
  0xde   :  { %1683 = vmatmul.mubr.bf16.gmra.mrb[16].mxu0 %v309_v62 }
  0xdf   :  { %1686 = vmatprep.mubr.msk.bf16.mxu0 %vm2045_vm4, %v2044_v40  ;;  %1622 = vmatpush3.bf16.msra.mxu0 %v1788_v11  ;;  %v1460_v11 = vld [vmem:[#allocation10] ss:$0 sm:$0xff] }
  0xe0   :  { %1623 = vmatprep.subr.bf16.mxu0 %v1790_v13 }
  0xe3   :  { %1624 = vmatpush3.bf16.msra.mxu0 %v1792_v15  ;;  %v1461_v15 = vld [vmem:[#allocation11] ss:$0 sm:$0xff] }
  0xe4   :  { %1625 = vmatprep.subr.bf16.mxu0 %v1794_v17 }
  0xe6   :  { %1687 = vmatmul.mubr.bf16.gmra.mrb[20].mxu0 %v308_v61 }
  0xe7   :  { %1626 = vmatpush3.bf16.msra.mxu0 %v1796_v19 }
  0xe8   :  { %1627 = vmatprep.subr.bf16.mxu0 %v1798_v21 }
  0xeb   :  { %1628 = vmatpush3.bf16.msra.mxu0 %v1800_v23 }
  0xec   :  { %1629 = vmatprep.subr.bf16.mxu0 %v1802_v25 }
  0xef   :  { %1630 = vmatpush3.bf16.msra.mxu0 %v1804_v27 }
  0xf0   :  { %1631 = vmatprep.subr.bf16.mxu0 %v1806_v29 }
  0xf3   :  { %1632 = vmatpush3.bf16.msra.mxu0 %v1807_v30 }
 0x129   :  { %v777_v19 = vpop.permute.xlu0 %776 }
 0x134   :  { %v782_v28 = vpop.permute.xlu0 %781 }
 0x189   :  { %v1520_v31 = vpop.f32.mrb[0].mxu0 }
 0x18a   :  { %v1554_v32 = vpop.f32.mrb[0].mxu1  ;;  %v1521_v33 = vpop.f32.mrb[1].mxu0 }
 0x18b   :  { %v1522_v34 = vadd.f32 %v1521_v33, %v1520_v31  ;;  %v1555_v35 = vpop.f32.mrb[1].mxu1  ;;  %v1523_v36 = vpop.f32.mrb[2].mxu0 }
 0x18c   :  { %v1556_v37 = vadd.f32 %v1555_v35, %v1554_v32  ;;  %v1557_v38 = vpop.f32.mrb[2].mxu1  ;;  %v1524_v39 = vpop.f32.mrb[3].mxu0 }
 0x18d   :  { %v1525_v43 = vadd.f32 %v1524_v39, %v1523_v36  ;;  %v1558_v44 = vpop.f32.mrb[3].mxu1  ;;  %v787_v35 = vpop.permute.xlu1 %786 }
 0x18e   :  { %v1559_v42 = vadd.f32 %v1558_v44, %v1557_v38  ;;  %v657_v45 = vadd.f32 %v1556_v37, %v1522_v34 }
 0x190   :  { %v660_v46 = vadd.f32 %v1559_v42, %v1525_v43 }
 0x191   :  { %v1526_v47 = vpop.f32.mrb[4].mxu0 }
 0x192   :  { %v1527_v48 = vpop.f32.mrb[5].mxu0  ;;  %v1560_v49 = vpop.f32.mrb[4].mxu1 }
 0x193   :  { %v1528_v50 = vadd.f32 %v1527_v48, %v1526_v47  ;;  %v1529_v51 = vpop.f32.mrb[6].mxu0  ;;  %v1561_v52 = vpop.f32.mrb[5].mxu1 }
 0x194   :  { %v1530_v53 = vpop.f32.mrb[7].mxu0  ;;  %v1562_v55 = vadd.f32 %v1561_v52, %v1560_v49  ;;  %v1563_v56 = vpop.f32.mrb[6].mxu1 }
 0x195   :  { %v1531_v41 = vadd.f32 %v1530_v53, %v1529_v51  ;;  %v1564_v54 = vpop.f32.mrb[7].mxu1  ;;  %v792_v48 = vpop.permute.xlu1 %791 }
 0x196   :  { %v1565_v57 = vadd.f32 %v1564_v54, %v1563_v56  ;;  %v665_v58 = vadd.f32 %v1562_v55, %v1528_v50 }
 0x198   :  { %v668_v60 = vadd.f32 %v1565_v57, %v1531_v41 }
 0x199   :  { %v1532_v59 = vpop.f32.mrb[8].mxu0 }
 0x19a   :  { %v1533_v61 = vpop.f32.mrb[9].mxu0 }
 0x19b   :  { %v1566_v62 = vpop.f32.mrb[8].mxu1  ;;  %v1534_v63 = vadd.f32 %v1533_v61, %v1532_v59  ;;  %v1535_v0 = vpop.f32.mrb[10].mxu0 }
 0x19c   :  { %v1567_v1 = vpop.f32.mrb[9].mxu1  ;;  %v1536_v2 = vpop.f32.mrb[11].mxu0 }
 0x19d   :  { %v1568_v3 = vadd.f32 %v1567_v1, %v1566_v62  ;;  %v1569_v4 = vpop.f32.mrb[10].mxu1  ;;  %v1537_v5 = vadd.f32 %v1536_v2, %v1535_v0 }
 0x19e   :  { %v1570_v6 = vpop.f32.mrb[11].mxu1 }
 0x19f   :  { %v1571_v7 = vadd.f32 %v1570_v6, %v1569_v4  ;;  %v673_v8 = vadd.f32 %v1568_v3, %v1534_v63 }
 0x1a1   :  { %v676_v9 = vadd.f32 %v1571_v7, %v1537_v5 }
 0x1a9   :  { %v713_v10 = vpop.f32.mrb[12].mxu0 }
 0x1aa   :  { %v714_v12 = vadd.f32 %v713_v10, %v657_v45  ;;  %v1680_v13 = vpop.f32.mrb[13].mxu0  ;;  %v802_v10 = vpop.permute.xlu1 %801 }
 0x1ab   :  { %v716_v14 = vpop.f32.mrb[14].mxu0 }
 0x1ac   :  { %v743_v16 = vmul.f32 %v1460_v11, %v714_v12  ;;  %v717_v17 = vadd.f32 %v716_v14, %v660_v46  ;;  %v1681_v18 = vpop.f32.mrb[15].mxu0  ;;  %v1808_v12 = vld [vmem:[#allocation8 + $0x100] sm:$0xff]  }
 0x1ae   :  { %v744_v20 = vmul.f32 %v1460_v11, %v717_v17  ;;  %v756_v21 = vadd.f32 %v1461_v15, %v743_v16 }
 0x1b0   :  { %v762_v22 = vmax.f32 %v756_v21, 0.0  ;;  %v757_v23 = vadd.f32 %v1461_v15, %v744_v20 }
 0x1b1   :  { %v721_v24 = vpop.f32.mrb[16].mxu0 }
 0x1b2   :  { %v763_v25 = vmax.f32 %v757_v23, 0.0  ;;  %v722_v26 = vadd.f32 %v721_v24, %v665_v58  ;;  %v1684_v27 = vpop.f32.mrb[17].mxu0  ;;  %v804_v30 = vmul.f32 %v777_v19, %v762_v22  ;;  %v1809_v22 = vld [vmem:[#allocation8 + $0x108] sm:$0xff]  }
 0x1b3   :  { %v724_v29 = vpop.f32.mrb[18].mxu0 }
 0x1b4   :  { %v805_v31 = vmul.f32 %v782_v28, %v763_v25  ;;  %v745_v32 = vmul.f32 %v1460_v11, %v722_v26  ;;  %v725_v33 = vadd.f32 %v724_v29, %v668_v60  ;;  %v1685_v34 = vpop.f32.mrb[19].mxu0 }
 0x1b6   :  { %v810_v36 = vpack.c.bf16 %v805_v31, %v804_v30  ;;  %v758_v37 = vadd.f32 %v1461_v15, %v745_v32  ;;  %v746_v38 = vmul.f32 %v1460_v11, %v725_v33  ;;  %v1810_v32 = vld [vmem:[#allocation8 + $0x110] sm:$0xff]  }
 0x1b8   :  { %v764_v39 = vmax.f32 %v758_v37, 0.0  ;;  %v759_v43 = vadd.f32 %v1461_v15, %v746_v38  ;;  %v816_v47 = vshll.u32 %v810_v36, 16  ;;  %v814_v56 = vshrl.u32 %v810_v36, 16  ;;  %v1811_v38 = vld [vmem:[#allocation8 + $0x118] sm:$0xff]  }
 0x1b9   :  { %v729_v44 = vpop.f32.mrb[20].mxu0  ;;  %v842_v59 = vrot.slane %v810_v36, 1  ;;  %v864_v60 = vrot.slane %v810_v36, 2 }
 0x1ba   :  { %v765_v42 = vmax.f32 %v759_v43, 0.0  ;;  %v730_v45 = vadd.f32 %v729_v44, %v673_v8  ;;  %v1688_v46 = vpop.f32.mrb[21].mxu0  ;;  %v806_v50 = vmul.f32 %v787_v35, %v764_v39  ;;  %v818_v58 = vrot.slane %v816_v47, 1  ;;  %v1812_v39 = vld [vmem:[#allocation8 + $0x120] sm:$0xff]   ;;  %v1813_v43 = vld [vmem:[#allocation8 + $0x128] sm:$0xff]   ;;  %v1814_v44 = vld [vmem:[#allocation8 + $0x130] sm:$0xff]  }
 0x1bb   :  { %v732_v49 = vpop.f32.mrb[22].mxu0  ;;  %v850_v1 = vrot.slane %v814_v56, 1  ;;  %v851_v2 = vrot.slane %v816_v47, 2 }
 0x1bc   :  { %v807_v51 = vmul.f32 %v792_v48, %v765_v42  ;;  %v747_v52 = vmul.f32 %v1460_v11, %v730_v45  ;;  %v733_v53 = vadd.f32 %v732_v49, %v676_v9  ;;  %v1689_v55 = vpop.f32.mrb[23].mxu0  ;;  %v819_v6 = vor.u32 %v818_v58, %v814_v56  ;;  %v797_v9 = vpop.permute.xlu0 %796  ;;  %v1815_v42 = vld [vmem:[#allocation8 + $0x138] sm:$0xff]  }
 0x1bd   :  { %v852_v18 = vor.u32 %v851_v2, %v850_v1 }
 0x1be   :  { %v811_v41 = vpack.c.bf16 %v807_v51, %v806_v50  ;;  %v760_v54 = vadd.f32 %v1461_v15, %v747_v52  ;;  %v748_v57 = vmul.f32 %v1460_v11, %v733_v53 }
 0x1c0   :  { %v766_v61 = vmax.f32 %v760_v54, 0.0  ;;  %v761_v62 = vadd.f32 %v1461_v15, %v748_v57  ;;  %v821_v63 = vshll.u32 %v811_v41, 16  ;;  %v825_v0 = vshrl.u32 %v811_v41, 16 }
 0x1c1   :  { %v843_v3 = vrot.slane %v811_v41, 1  ;;  %v865_v4 = vrot.slane %v811_v41, 2 }
 0x1c2   :  { %v767_v5 = vmax.f32 %v761_v62, 0.0  ;;  %v823_v7 = vrot.slane %v821_v63, 1  ;;  %v853_v8 = vrot.slane %v825_v0, 1  ;;  %v854_v13 = vrot.slane %v821_v63, 2 }
 0x1c3   :  { %v844_v11 = vsel %vm176_vm2, %v842_v59, %v843_v3  ;;  %v866_v14 = vsel %vm202_vm1, %v864_v60, %v865_v4  ;;  %v808_v16 = vmul.f32 %v797_v9, %v766_v61 }
 0x1c4   :  { %v809_v15 = vmul.f32 %v802_v10, %v767_v5  ;;  %v824_v17 = vsel %vm143_vm0, %v819_v6, %v823_v7  ;;  %v855_v19 = vor.u32 %v854_v13, %v853_v8  ;;  %v827_v27 = vor.u32 %v825_v0, %v823_v7 }
 0x1c5   :  { %1224 = vmatprep.mubr.bf16.mxu1 %v824_v17 }
 0x1c6   :  { %v812_v20 = vpack.c.bf16 %v809_v15, %v808_v16  ;;  %1225 = vmatmul.mubr.bf16.vlgmr.msra.gmra.mrb[12].mxu1 %v810_v36  ;;  %v856_v21 = vsel %vm184_vm3, %v852_v18, %v855_v19 }
 0x1c7   :  { %1691 = vmatpush3.bf16.msra.mxu1 %v1808_v12  ;;  %1280 = vmatprep.mubr.bf16.mxu0 %v856_v21 }
 0x1c8   :  { %1692 = vmatprep.subr.bf16.mxu1 %v2044_v40  ;;  %v829_v23 = vshll.u32 %v812_v20, 16  ;;  %v833_v24 = vshrl.u32 %v812_v20, 16  ;;  %v845_v25 = vrot.slane %v812_v20, 1  ;;  %v867_v26 = vrot.slane %v812_v20, 2  ;;  %1281 = vmatmul.mubr.bf16.vlgmr.msra.gmra.mrb[24].mxu0 %v844_v11 }
 0x1ca   :  { %v831_v28 = vrot.slane %v829_v23, 1  ;;  %v857_v29 = vrot.slane %v833_v24, 1  ;;  %v858_v30 = vrot.slane %v829_v23, 2  ;;  %v846_v31 = vsel %vm176_vm2, %v843_v3, %v845_v25 }
 0x1cb   :  { %1693 = vmatpush3.bf16.msra.mxu1 %v1809_v22  ;;  %v868_v33 = vsel %vm202_vm1, %v865_v4, %v867_v26  ;;  %v1503_v22 = vld [vmem:[#allocation14] ss:$0 sm:$0xff] }
 0x1cc   :  { %v832_v34 = vsel %vm143_vm0, %v827_v27, %v831_v28  ;;  %1694 = vmatprep.subr.bf16.mxu1 %v2044_v40  ;;  %v835_v35 = vor.u32 %v833_v24, %v831_v28  ;;  %v859_v36 = vor.u32 %v858_v30, %v857_v29  ;;  %v1816_v29 = vld [vmem:[#allocation2 + $0x8] sm:$0xff] }
 0x1cd   :  { %1232 = vmatprep.mubr.bf16.mxu1 %v832_v34  ;;  %v1817_v34 = vld [vmem:[#allocation2 + $0x10] sm:$0xff] }
 0x1ce   :  { %1233 = vmatmul.mubr.bf16.gmra.mrb[16].mxu1 %v811_v41  ;;  %v860_v37 = vsel %vm184_vm3, %v855_v19, %v859_v36  ;;  %v1502_v19 = vld [vmem:[#allocation13] ss:$0 sm:$0xff] }
 0x1cf   :  { %1695 = vmatpush3.bf16.msra.mxu1 %v1810_v32  ;;  %1240 = vmatprep.mubr.bf16.mxu1 %v835_v35 }
 0x1d0   :  { %1288 = vmatprep.mubr.bf16.mxu0 %v860_v37  ;;  %1696 = vmatprep.subr.bf16.mxu1 %v2044_v40 }
 0x1d1   :  { %1289 = vmatmul.mubr.bf16.gmra.mrb[28].mxu0 %v846_v31 }
 0x1d2   :  { %1296 = vmatprep.mubr.bf16.mxu0 %v859_v36 }
 0x1d3   :  { %1697 = vmatpush3.bf16.msra.mxu1 %v1811_v38 }
 0x1d4   :  { %1698 = vmatprep.subr.bf16.mxu1 %v2044_v40 }
 0x1d6   :  { %1241 = vmatmul.mubr.bf16.gmra.mrb[20].mxu1 %v812_v20 }
 0x1d7   :  { %1699 = vmatpush3.bf16.msra.mxu1 %v1812_v39  ;;  %1706 = vmatprep.mubr.msk.bf16.mxu1 %vm2045_vm4, %v2044_v40 }
 0x1d8   :  { %1700 = vmatprep.subr.bf16.mxu1 %v2044_v40 }
 0x1d9   :  { %1297 = vmatmul.mubr.bf16.gmra.mrb[32].mxu0 %v845_v25 }
 0x1db   :  { %1701 = vmatpush3.bf16.msra.mxu1 %v1813_v43 }
 0x1dc   :  { %1702 = vmatprep.subr.bf16.mxu1 %v2044_v40 }
 0x1df   :  { %1703 = vmatpush3.bf16.msra.mxu1 %v1814_v44 }
 0x1e0   :  { %1704 = vmatprep.subr.bf16.mxu1 %v2044_v40 }
 0x1e3   :  { %1705 = vmatpush3.bf16.msra.mxu1 %v1815_v42 }
 0x1e6   :  { %1707 = vmatmul.mubr.bf16.vlgmr.msra.gmra.mrb[24].mxu1 %v866_v14 }
 0x1e7   :  { %1710 = vmatprep.mubr.msk.bf16.mxu1 %vm2045_vm4, %v2044_v40 }
 0x1ee   :  { %1711 = vmatmul.mubr.bf16.gmra.mrb[28].mxu1 %v868_v33 }
 0x1ef   :  { %1714 = vmatprep.mubr.msk.bf16.mxu1 %vm2045_vm4, %v2044_v40 }
 0x1f6   :  { %1715 = vmatmul.mubr.bf16.gmra.mrb[32].mxu1 %v867_v26 }
 0x299   :  { %v1599_v45 = vpop.f32.mrb[12].mxu1 }
 0x29a   :  { %v1600_v46 = vpop.f32.mrb[13].mxu1 }
 0x29b   :  { %v1601_v47 = vadd.f32 %v1600_v46, %v1599_v45  ;;  %v1602_v48 = vpop.f32.mrb[14].mxu1  ;;  %v1633_v49 = vpop.f32.mrb[24].mxu0 }
 0x29c   :  { %v1603_v50 = vpop.f32.mrb[15].mxu1  ;;  %v1634_v52 = vpop.f32.mrb[25].mxu0 }
 0x29d   :  { %v1604_v51 = vadd.f32 %v1603_v50, %v1602_v48  ;;  %v1635_v53 = vadd.f32 %v1634_v52, %v1633_v49  ;;  %v1636_v55 = vpop.f32.mrb[26].mxu0  ;;  %v1819_v52 = vld [vmem:[#allocation2 + $0x20] sm:$0xff] }
 0x29e   :  { %v1637_v56 = vpop.f32.mrb[27].mxu0 }
 0x29f   :  { %v1638_v41 = vadd.f32 %v1637_v56, %v1636_v55  ;;  %v1283_v54 = vadd.f32 %v1635_v53, %v1601_v47  ;;  %v1818_v47 = vld [vmem:[#allocation2 + $0x18] sm:$0xff] }
 0x2a1   :  { %v1605_v57 = vpop.f32.mrb[16].mxu1  ;;  %v1286_v59 = vadd.f32 %v1638_v41, %v1604_v51 }
 0x2a2   :  { %v1606_v58 = vpop.f32.mrb[17].mxu1 }
 0x2a3   :  { %v1607_v60 = vadd.f32 %v1606_v58, %v1605_v57  ;;  %v1608_v61 = vpop.f32.mrb[18].mxu1 }
 0x2a4   :  { %v1639_v40 = vpop.f32.mrb[28].mxu0  ;;  %v1609_v62 = vpop.f32.mrb[19].mxu1 }
 0x2a5   :  { %v1610_v63 = vadd.f32 %v1609_v62, %v1608_v61  ;;  %v1640_v0 = vpop.f32.mrb[29].mxu0 }
 0x2a6   :  { %v1641_v1 = vadd.f32 %v1640_v0, %v1639_v40  ;;  %v1642_v2 = vpop.f32.mrb[30].mxu0 }
 0x2a7   :  { %v1643_v3 = vpop.f32.mrb[31].mxu0 }
 0x2a8   :  { %v1644_v4 = vadd.f32 %v1643_v3, %v1642_v2  ;;  %v1291_v5 = vadd.f32 %v1641_v1, %v1607_v60  ;;  %v1820_v60 = vld [vmem:[#allocation2 + $0x28] sm:$0xff] }
 0x2a9   :  { %v1611_v6 = vpop.f32.mrb[20].mxu1 }
 0x2aa   :  { %v1612_v7 = vpop.f32.mrb[21].mxu1  ;;  %v1294_v8 = vadd.f32 %v1644_v4, %v1610_v63 }
 0x2ab   :  { %v1613_v9 = vadd.f32 %v1612_v7, %v1611_v6  ;;  %v1614_v10 = vpop.f32.mrb[22].mxu1 }
 0x2ac   :  { %v1645_v12 = vpop.f32.mrb[32].mxu0  ;;  %v1615_v13 = vpop.f32.mrb[23].mxu1 }
 0x2ad   :  { %v1646_v11 = vpop.f32.mrb[33].mxu0 }
 0x2ae   :  { %v1647_v14 = vadd.f32 %v1646_v11, %v1645_v12  ;;  %v1648_v16 = vpop.f32.mrb[34].mxu0 }
 0x2af   :  { %v1649_v15 = vpop.f32.mrb[35].mxu0 }
 0x2b0   :  { %v1299_v17 = vadd.f32 %v1647_v14, %v1613_v9 }
 0x2b9   :  { %v1338_v18 = vpop.f32.mrb[24].mxu1 }
 0x2ba   :  { %v1339_v20 = vadd.f32 %v1338_v18, %v1283_v54  ;;  %v1708_v21 = vpop.f32.mrb[25].mxu1 }
 0x2bb   :  { %v1341_v23 = vpop.f32.mrb[26].mxu1 }
 0x2bc   :  { %v1367_v24 = vmul.f32 %v1502_v19, %v1339_v20  ;;  %v1342_v25 = vadd.f32 %v1341_v23, %v1286_v59  ;;  %v1709_v26 = vpop.f32.mrb[27].mxu1 }
 0x2be   :  { %v1379_v27 = vadd.f32 %v1503_v22, %v1367_v24  ;;  %v1368_v28 = vmul.f32 %v1502_v19, %v1342_v25 }
 0x2c0   :  { %v1384_v30 = vadd.f32 %v1816_v29, %v1379_v27  ;;  %v1380_v31 = vadd.f32 %v1503_v22, %v1368_v28 }
 0x2c1   :  { %v1346_v32 = vpop.f32.mrb[28].mxu1 }
 0x2c2   :  { %v1389_v33 = vmax.f32 %v1384_v30, 0.0  ;;  %v1385_v35 = vadd.f32 %v1817_v34, %v1380_v31  ;;  %v1347_v36 = vadd.f32 %v1346_v32, %v1291_v5  ;;  %v1712_v37 = vpop.f32.mrb[29].mxu1 }
 0x2c3   :  { %v1349_v38 = vpop.f32.mrb[30].mxu1 }
 0x2c4   :  { %1394 = vst [vmem:[#allocation16] sm:$0xff] %v1389_v33  ;;  %v1390_v39 = vmax.f32 %v1385_v35, 0.0  ;;  %v1369_v43 = vmul.f32 %v1502_v19, %v1347_v36  ;;  %v1350_v44 = vadd.f32 %v1349_v38, %v1294_v8  ;;  %v1713_v42 = vpop.f32.mrb[31].mxu1 }
 0x2c6   :  { %1395 = vst [vmem:[#allocation16 + $0x8] sm:$0xff] %v1390_v39  ;;  %v1381_v45 = vadd.f32 %v1503_v22, %v1369_v43  ;;  %v1370_v46 = vmul.f32 %v1502_v19, %v1350_v44 }
 0x2c8   :  { %v1386_v48 = vadd.f32 %v1818_v47, %v1381_v45  ;;  %v1382_v49 = vadd.f32 %v1503_v22, %v1370_v46 }
 0x2c9   :  { %v1354_v50 = vpop.f32.mrb[32].mxu1 }
 0x2ca   :  { %v1391_v51 = vmax.f32 %v1386_v48, 0.0  ;;  %v1387_v53 = vadd.f32 %v1819_v52, %v1382_v49  ;;  %v1355_v55 = vadd.f32 %v1354_v50, %v1299_v17  ;;  %v1716_v56 = vpop.f32.mrb[33].mxu1 }
 0x2cb   :  { %v1357_v41 = vpop.f32.mrb[34].mxu1 }
 0x2cc   :  { %1396 = vst [vmem:[#allocation16 + $0x10] sm:$0xff] %v1391_v51  ;;  %v1392_v54 = vmax.f32 %v1387_v53, 0.0  ;;  %v1371_v57 = vmul.f32 %v1502_v19, %v1355_v55  ;;  %v1717_v58 = vpop.f32.mrb[35].mxu1 }
 0x2ce   :  { %1397 = vst [vmem:[#allocation16 + $0x18] sm:$0xff] %v1392_v54  ;;  %v1383_v59 = vadd.f32 %v1503_v22, %v1371_v57 }
 0x2d0   :  { %v1388_v61 = vadd.f32 %v1820_v60, %v1383_v59 }
 0x2d2   :  { %v1393_v40 = vmax.f32 %v1388_v61, 0.0 }
 0x2d4   :  { %1398 = vst [vmem:[#allocation16 + $0x20] sm:$0xff] %v1393_v40 }
 0x2d5   :  { %2008 = shalt.err (!%p2005_p12)
}
 0x2d6   :  { %s2009_s19 = scalar_lea.hbm %s2307_s8, 640 }
 0x2d7   :  { %p2010_p13 = scmp.ne.s32.totalorder %s2307_s8, %s2009_s19  ;;  %p2013_p0 = scmp.lt.u32.totalorder %s2009_s19, %s2307_s8 }
 0x2d9   :  { %p2015_p1 = pnand %p2013_p0, %p2010_p13 }
 0x2db   :  { %2018 = shalt.err (!%p2015_p1)
}
 0x2dc   :  { %1410 = dma.vmem_to_hbm [thread:$0]  %s1405_s28, 640, %s2307_s8, [#allocation4], %s2032_s15, %s2032_s15, %s2033_s16  }
 0x2dd   :  { %2029 = dma.done.wait [#allocation4], 640  }
 0x2de   :  { %2030 = vsyncadd [#allocation4], 4294966656 }
 0x2df   :  { %1414 = vsyncpa [#allocation3], 1 }
 0x2e0   :  { %1415 = vsyncpa [#allocation6], 1 }
 0x2e1   :  { %1416 = vsyncpa [#allocation9], 1 }
 0x2e2   :  { %1417 = vsyncpa [#allocation12], 1 }
 0x2e3   :  { %1418 = vsyncpa [#allocation15], 1 }
 0x2e4   :  { %1419 = vsyncpa [#allocation4], 1 }

</bundles_post_ra>
